<compile_context>
chip_gen: v7x
topology: tpu7x:2x2x1
jax: 0.10.0
libtpu: 0.0.40
codegen_flags: <defaults>
</compile_context>

<pallas_src>
import jax
import jax.numpy as jnp
from jax.experimental import pallas as pl
from jax.experimental.pallas import tpu as pltpu


def _patch_proj_kernel(x_ref, w_ref, add_ref, o_ref):
    # x_ref:   (tm, CIN)  bf16  row-tile of flattened patches (rows = b*N + n)
    # w_ref:   (CIN, E)   bf16  projection weight (resident across grid steps)
    # add_ref: (tm, E)    f32   per-row additive term = positions[1 + n] + bias
    # o_ref:   (tm, E)    f32   projected patch rows (aligned whole-block store)
    proj = jnp.dot(x_ref[...], w_ref[...], preferred_element_type=jnp.float32)
    o_ref[...] = proj + add_ref[...]


def patch_embedding_block(x, w, bias, cls_token, positions):
    """x: (B, N, C, H, W) float32 -> (B, N+1, E) float32."""
    B, N, C, H, W = x.shape
    CIN = C * H * W
    E = w.shape[1]
    assert positions.shape == (N + 1, E)
    M = B * N

    # Glue: flatten each patch row-major (NCHW) and fold batch into M.
    x_flat = x.reshape(M, CIN).astype(jnp.bfloat16)
    w_bf16 = w.astype(jnp.bfloat16)

    # Pre-fold bias into the positional term; tile over batches so row r of the
    # fused M dimension gets positions[1 + (r % N)] + bias.  Tiny (M, E) array,
    # keeps the kernel epilogue a single aligned add with any M tiling.
    add = jnp.tile(positions[1:] + bias[None, :], (B, 1)).astype(jnp.float32)

    # Row-tile of 128 when M allows it (keeps v7x's two TCs busy at scale);
    # otherwise a single grid step covering all M rows (this example: M=16).
    tm = 128 if (M % 128 == 0) else M
    grid = (M // tm,)

    proj = pl.pallas_call(
        _patch_proj_kernel,
        out_shape=jax.ShapeDtypeStruct((M, E), jnp.float32),
        grid_spec=pl.GridSpec(
            grid=grid,
            in_specs=[
                pl.BlockSpec((tm, CIN), lambda i: (i, 0)),
                pl.BlockSpec((CIN, E), lambda i: (0, 0)),
                pl.BlockSpec((tm, E), lambda i: (i, 0)),
            ],
            out_specs=pl.BlockSpec((tm, E), lambda i: (i, 0)),
        ),
        compiler_params=pltpu.CompilerParams(
            dimension_semantics=("parallel",)),
    )(x_flat, w_bf16, add)

    proj = proj.reshape(B, N, E)

    # Batch-invariant cls row assembled outside the kernel (trivial broadcast).
    cls_row = (cls_token.reshape(1, E) + positions[0:1]).astype(jnp.float32)
    cls_rows = jnp.broadcast_to(cls_row[None, :, :], (B, 1, E))
    return jnp.concatenate([cls_rows, proj], axis=1)


if __name__ == "__main__":
    # Small shapes consistent with the module: batch=2, num_words=8,
    # per-patch image (C, H, W) = (4, 16, 16), emb_size=32.
    B, N, C, H, W, E = 2, 8, 4, 16, 16, 32
    CIN = C * H * W

    key = jax.random.PRNGKey(0)
    kx, kw, kb, kcls, kpos = jax.random.split(key, 5)

    x = jax.random.normal(kx, (B, N, C, H, W), dtype=jnp.float32)
    # Deterministic parameter init (synthetic weights, not a checkpoint).
    w = jax.random.normal(kw, (CIN, E), dtype=jnp.float32) * 0.02
    bias = jax.random.normal(kb, (E,), dtype=jnp.float32) * 0.02
    cls_token = jax.random.normal(kcls, (1, 1, E), dtype=jnp.float32)
    positions = jax.random.normal(kpos, (N + 1, E), dtype=jnp.float32)

    out = patch_embedding_block(x, w, bias, cls_token, positions)
    out = jax.block_until_ready(out)

    # Reference check in plain f32 JAX (kernel uses bf16 inputs w/ f32 accum,
    # so tolerance is loosened accordingly).
    proj_ref = x.reshape(B * N, CIN) @ w + bias            # (B*N, E)
    proj_ref = proj_ref.reshape(B, N, E)
    cls_ref = jnp.broadcast_to(cls_token, (B, 1, E))
    ref = jnp.concatenate([cls_ref, proj_ref], axis=1) + positions[None]
    assert out.shape == (B, N + 1, E)
    assert jnp.allclose(out, ref, atol=1e-2, rtol=1e-2)

    print("KERNEL_OK")
</pallas_src>

<mosaic_0001>
module attributes {stable_mosaic.version = 11 : i64} {
  func.func @_patch_proj_kernel(%arg0: i32, %arg1: memref<16x1024xbf16, #tpu.memory_space<vmem>>, %arg2: memref<1024x32xbf16, #tpu.memory_space<vmem>>, %arg3: memref<16x32xf32, #tpu.memory_space<vmem>>, %arg4: memref<16x32xf32, #tpu.memory_space<vmem>>) attributes {dimension_semantics = [#tpu.dimension_semantics<parallel>], iteration_bounds = array<i64: 1>, scalar_prefetch = 0 : i64, scratch_operands = 0 : i64, tpu.core_type = #tpu.core_type<tc>, window_params = [{transform_indices = @transform_0, window_bounds = array<i64: 16, 1024>}, {pipeline_mode = #tpu.pipeline_mode<synchronous>, transform_indices = @transform_1, window_bounds = array<i64: 1024, 32>}, {transform_indices = @transform_2, window_bounds = array<i64: 16, 32>}, {transform_indices = @transform_3, window_bounds = array<i64: 16, 32>}]} {
    %c0 = arith.constant 0 : index
    %c0_0 = arith.constant 0 : index
    %0 = vector.load %arg1[%c0, %c0_0] : memref<16x1024xbf16, #tpu.memory_space<vmem>>, vector<16x1024xbf16>
    %c0_1 = arith.constant 0 : index
    %c0_2 = arith.constant 0 : index
    %1 = vector.load %arg2[%c0_1, %c0_2] : memref<1024x32xbf16, #tpu.memory_space<vmem>>, vector<1024x32xbf16>
    %cst = arith.constant dense<0.000000e+00> : vector<16x32xf32>
    %2 = tpu.matmul %0, %1, %cst {dimension_numbers = #tpu.dot_dimension_numbers<[1], [0], [0], [1], [0, 0, 1, 1], [], []>} : vector<16x1024xbf16>, vector<1024x32xbf16>, vector<16x32xf32> -> vector<16x32xf32>
    %c0_3 = arith.constant 0 : index
    %c0_4 = arith.constant 0 : index
    %3 = vector.load %arg3[%c0_3, %c0_4] : memref<16x32xf32, #tpu.memory_space<vmem>>, vector<16x32xf32>
    %4 = arith.addf %2, %3 : vector<16x32xf32>
    %c0_5 = arith.constant 0 : index
    %c0_6 = arith.constant 0 : index
    %5 = vector.load %arg4[%c0_5, %c0_6] : memref<16x32xf32, #tpu.memory_space<vmem>>, vector<16x32xf32>
    tpu.vector_store %arg4[%c0_5, %c0_6], %4 {strides = array<i32>} : memref<16x32xf32, #tpu.memory_space<vmem>>, vector<16x32xf32>,
    return
  }
  func.func @transform_0(%arg0: i32) -> (i32, i32) {
    %c0_i32 = arith.constant 0 : i32
    %c0_i32_0 = arith.constant 0 : i32
    return %arg0, %c0_i32 : i32, i32
  }
  func.func @transform_1(%arg0: i32) -> (i32, i32) {
    %c0_i32 = arith.constant 0 : i32
    %c0_i32_0 = arith.constant 0 : i32
    %c0_i32_1 = arith.constant 0 : i32
    return %c0_i32, %c0_i32_0 : i32, i32
  }
  func.func @transform_2(%arg0: i32) -> (i32, i32) {
    %c0_i32 = arith.constant 0 : i32
    %c0_i32_0 = arith.constant 0 : i32
    return %arg0, %c0_i32 : i32, i32
  }
  func.func @transform_3(%arg0: i32) -> (i32, i32) {
    %c0_i32 = arith.constant 0 : i32
    %c0_i32_0 = arith.constant 0 : i32
    return %arg0, %c0_i32 : i32, i32
  }
}

</mosaic_0001>

<bundles_post_ra>
// kernel: tpu_custom_call.1
= control target key start
LH: loop header
LB: loop body
LE: loop exit
PB: predicated region body
PF: predicated region fallthrough
CT: control target
= control target key end

     0   :  { %s1269_s0 = inlined_call_operand.vmem [shape: bf16[16,1024], index: 0, kind: input, shape index: {}]   ;;  %s1270_s1 = inlined_call_operand.vmem [shape: bf16[1024,32], index: 1, kind: input, shape index: {}]   ;;  %s1271_s2 = inlined_call_operand.vmem [shape: f32[16,32], index: 2, kind: input, shape index: {}]   ;;  %s1272_s3 = inlined_call_operand.hbm [shape: f32[16,32], index: 3, kind: output, shape index: {}]  }
   0x1   :  { %v924_v0 = vld [vmem:[%s1270_s1 + $0x40] sm:$0xff]   ;;  %v928_v4 = vld [vmem:[%s1270_s1 + $0x48] sm:$0xff]   ;;  %v932_v8 = vld [vmem:[%s1270_s1 + $0x50] sm:$0xff]  }
   0x2   :  { %v925_v1 = vld [vmem:[%s1270_s1 + $0xc0] sm:$0xff]   ;;  %833 = vmatprep.subr.bf16.mxu0 %v924_v0  ;;  %v929_v5 = vld [vmem:[%s1270_s1 + $0xc8] sm:$0xff]   ;;  %v933_v9 = vld [vmem:[%s1270_s1 + $0xd0] sm:$0xff]  }
   0x3   :  { %v926_v2 = vld [vmem:[%s1270_s1] sm:$0xff]   ;;  %855 = vmatprep.subr.bf16.mxu1 %v925_v1  ;;  %v930_v6 = vld [vmem:[%s1270_s1 + $0x8] sm:$0xff]   ;;  %v934_v10 = vld [vmem:[%s1270_s1 + $0x10] sm:$0xff]  }
   0x4   :  { %v927_v3 = vld [vmem:[%s1270_s1 + $0x80] sm:$0xff]   ;;  %834 = vmatpush3.bf16.msra.mxu0 %v926_v2  ;;  %v931_v7 = vld [vmem:[%s1270_s1 + $0x88] sm:$0xff]   ;;  %v935_v11 = vld [vmem:[%s1270_s1 + $0x90] sm:$0xff]  }
   0x5   :  { %856 = vmatpush3.bf16.msra.mxu1 %v927_v3  ;;  %835 = vmatprep.subr.bf16.mxu0 %v928_v4  ;;  %v936_v12 = vld [vmem:[%s1270_s1 + $0x58] sm:$0xff]   ;;  %v940_v16 = vld [vmem:[%s1270_s1 + $0x60] sm:$0xff]   ;;  %v944_v20 = vld [vmem:[%s1270_s1 + $0x68] sm:$0xff]  }
   0x6   :  { %857 = vmatprep.subr.bf16.mxu1 %v929_v5  ;;  %v937_v13 = vld [vmem:[%s1270_s1 + $0xd8] sm:$0xff]   ;;  %v941_v17 = vld [vmem:[%s1270_s1 + $0xe0] sm:$0xff]   ;;  %v945_v21 = vld [vmem:[%s1270_s1 + $0xe8] sm:$0xff]  }
   0x7   :  { %v938_v14 = vld [vmem:[%s1270_s1 + $0x18] sm:$0xff]   ;;  %v942_v18 = vld [vmem:[%s1270_s1 + $0x20] sm:$0xff]   ;;  %v946_v22 = vld [vmem:[%s1270_s1 + $0x28] sm:$0xff]  }
   0x8   :  { %836 = vmatpush3.bf16.msra.mxu0 %v930_v6  ;;  %v939_v15 = vld [vmem:[%s1270_s1 + $0x98] sm:$0xff]   ;;  %v943_v19 = vld [vmem:[%s1270_s1 + $0xa0] sm:$0xff]   ;;  %v947_v23 = vld [vmem:[%s1270_s1 + $0xa8] sm:$0xff]  }
   0x9   :  { %858 = vmatpush3.bf16.msra.mxu1 %v931_v7  ;;  %837 = vmatprep.subr.bf16.mxu0 %v932_v8  ;;  %v948_v24 = vld [vmem:[%s1270_s1 + $0x70] sm:$0xff]   ;;  %v952_v28 = vld [vmem:[%s1270_s1 + $0x78] sm:$0xff]   ;;  %v16_v32 = vld [vmem:[%s1269_s0] sm:$0xff] }
   0xa   :  { %859 = vmatprep.subr.bf16.mxu1 %v933_v9  ;;  %v949_v25 = vld [vmem:[%s1270_s1 + $0xf0] sm:$0xff]   ;;  %v953_v29 = vld [vmem:[%s1270_s1 + $0xf8] sm:$0xff]   ;;  %v20_v33 = vld [vmem:[%s1269_s0 + $0x20] sm:$0xff] }
   0xb   :  { %v950_v26 = vld [vmem:[%s1270_s1 + $0x30] sm:$0xff]   ;;  %v954_v30 = vld [vmem:[%s1270_s1 + $0x38] sm:$0xff]   ;;  %v17_v34 = vld [vmem:[%s1269_s0 + $0x8] sm:$0xff]  ;;  %v761_v35 = vcombine.low %v16_v32, %v20_v33  ;;  %v762_v36 = vcombine.high %v16_v32, %v20_v33 }
   0xc   :  { %838 = vmatpush3.bf16.msra.mxu0 %v934_v10  ;;  %v951_v27 = vld [vmem:[%s1270_s1 + $0xb0] sm:$0xff]   ;;  %v955_v31 = vld [vmem:[%s1270_s1 + $0xb8] sm:$0xff]   ;;  %v21_v37 = vld [vmem:[%s1269_s0 + $0x28] sm:$0xff] }
   0xd   :  { %860 = vmatpush3.bf16.msra.mxu1 %v935_v11  ;;  %839 = vmatprep.subr.bf16.mxu0 %v936_v12  ;;  %v763_v38 = vcombine.low %v17_v34, %v21_v37  ;;  %v764_v39 = vcombine.high %v17_v34, %v21_v37  ;;  %v956_v40 = vld [vmem:[%s1270_s1 + $0x140] sm:$0xff]   ;;  %v960_v44 = vld [vmem:[%s1270_s1 + $0x148] sm:$0xff]   ;;  %v964_v48 = vld [vmem:[%s1270_s1 + $0x150] sm:$0xff]  }
   0xe   :  { %861 = vmatprep.subr.bf16.mxu1 %v937_v13  ;;  %610 = vmatprep.mubr.bf16.mxu0 %v762_v36  ;;  %v957_v41 = vld [vmem:[%s1270_s1 + $0x1c0] sm:$0xff]   ;;  %v961_v45 = vld [vmem:[%s1270_s1 + $0x1c8] sm:$0xff]   ;;  %v965_v49 = vld [vmem:[%s1270_s1 + $0x1d0] sm:$0xff]  }
   0xf   :  { %651 = vmatprep.mubr.bf16.mxu1 %v764_v39  ;;  %v958_v42 = vld [vmem:[%s1270_s1 + $0x100] sm:$0xff]   ;;  %v962_v46 = vld [vmem:[%s1270_s1 + $0x108] sm:$0xff]   ;;  %v966_v50 = vld [vmem:[%s1270_s1 + $0x110] sm:$0xff]  }
  0x10   :  { %840 = vmatpush3.bf16.msra.mxu0 %v938_v14  ;;  %v959_v43 = vld [vmem:[%s1270_s1 + $0x180] sm:$0xff]   ;;  %v963_v47 = vld [vmem:[%s1270_s1 + $0x188] sm:$0xff]   ;;  %v967_v51 = vld [vmem:[%s1270_s1 + $0x190] sm:$0xff]  }
  0x11   :  { %862 = vmatpush3.bf16.msra.mxu1 %v939_v15  ;;  %841 = vmatprep.subr.bf16.mxu0 %v940_v16  ;;  %v968_v52 = vld [vmem:[%s1270_s1 + $0x158] sm:$0xff]   ;;  %v972_v56 = vld [vmem:[%s1270_s1 + $0x160] sm:$0xff]   ;;  %v976_v60 = vld [vmem:[%s1270_s1 + $0x168] sm:$0xff]  }
  0x12   :  { %863 = vmatprep.subr.bf16.mxu1 %v941_v17  ;;  %v969_v53 = vld [vmem:[%s1270_s1 + $0x1d8] sm:$0xff]   ;;  %v973_v57 = vld [vmem:[%s1270_s1 + $0x1e0] sm:$0xff]   ;;  %v977_v61 = vld [vmem:[%s1270_s1 + $0x1e8] sm:$0xff]  }
  0x13   :  { %v970_v54 = vld [vmem:[%s1270_s1 + $0x118] sm:$0xff]   ;;  %v974_v58 = vld [vmem:[%s1270_s1 + $0x120] sm:$0xff]   ;;  %v978_v62 = vld [vmem:[%s1270_s1 + $0x128] sm:$0xff]  }
  0x14   :  { %842 = vmatpush3.bf16.msra.mxu0 %v942_v18  ;;  %v971_v55 = vld [vmem:[%s1270_s1 + $0x198] sm:$0xff]   ;;  %v975_v59 = vld [vmem:[%s1270_s1 + $0x1a0] sm:$0xff]   ;;  %v979_v63 = vld [vmem:[%s1270_s1 + $0x1a8] sm:$0xff]  }
  0x15   :  { %864 = vmatpush3.bf16.msra.mxu1 %v943_v19  ;;  %843 = vmatprep.subr.bf16.mxu0 %v944_v20  ;;  %v980_v0 = vld [vmem:[%s1270_s1 + $0x170] sm:$0xff]   ;;  %v984_v4 = vld [vmem:[%s1270_s1 + $0x178] sm:$0xff]  }
  0x16   :  { %865 = vmatprep.subr.bf16.mxu1 %v945_v21  ;;  %v981_v1 = vld [vmem:[%s1270_s1 + $0x1f0] sm:$0xff]   ;;  %v985_v5 = vld [vmem:[%s1270_s1 + $0x1f8] sm:$0xff]  }
  0x17   :  { %v982_v2 = vld [vmem:[%s1270_s1 + $0x130] sm:$0xff]   ;;  %v986_v6 = vld [vmem:[%s1270_s1 + $0x138] sm:$0xff]  }
  0x18   :  { %844 = vmatpush3.bf16.msra.mxu0 %v946_v22  ;;  %v983_v3 = vld [vmem:[%s1270_s1 + $0x1b0] sm:$0xff]   ;;  %v987_v7 = vld [vmem:[%s1270_s1 + $0x1b8] sm:$0xff]  }
  0x19   :  { %866 = vmatpush3.bf16.msra.mxu1 %v947_v23  ;;  %845 = vmatprep.subr.bf16.mxu0 %v948_v24  ;;  %v18_v8 = vld [vmem:[%s1269_s0 + $0x10] sm:$0xff]  ;;  %v19_v12 = vld [vmem:[%s1269_s0 + $0x18] sm:$0xff] }
  0x1a   :  { %867 = vmatprep.subr.bf16.mxu1 %v949_v25  ;;  %v22_v9 = vld [vmem:[%s1269_s0 + $0x30] sm:$0xff]  ;;  %v23_v13 = vld [vmem:[%s1269_s0 + $0x38] sm:$0xff] }
  0x1b   :  { %v765_v10 = vcombine.low %v18_v8, %v22_v9  ;;  %v766_v11 = vcombine.high %v18_v8, %v22_v9 }
  0x1c   :  { %846 = vmatpush3.bf16.msra.mxu0 %v950_v26 }
  0x1d   :  { %868 = vmatpush3.bf16.msra.mxu1 %v951_v27  ;;  %847 = vmatprep.subr.bf16.mxu0 %v952_v28 }
  0x1e   :  { %869 = vmatprep.subr.bf16.mxu1 %v953_v29 }
  0x20   :  { %848 = vmatpush3.bf16.msra.mxu0 %v954_v30 }
  0x21   :  { %870 = vmatpush3.bf16.msra.mxu1 %v955_v31  ;;  %877 = vmatprep.subr.bf16.mxu0 %v956_v40 }
  0x22   :  { %899 = vmatprep.subr.bf16.mxu1 %v957_v41 }
  0x23   :  { %611 = vmatmul.mubr.bf16.vlgmr.msra.gmra.mrb[0].mxu0 %v761_v35 }
  0x24   :  { %652 = vmatmul.mubr.bf16.vlgmr.msra.gmra.mrb[0].mxu1 %v763_v38  ;;  %878 = vmatpush3.bf16.msra.mxu0 %v958_v42 }
  0x25   :  { %900 = vmatpush3.bf16.msra.mxu1 %v959_v43  ;;  %879 = vmatprep.subr.bf16.mxu0 %v960_v44 }
  0x26   :  { %901 = vmatprep.subr.bf16.mxu1 %v961_v45 }
  0x28   :  { %880 = vmatpush3.bf16.msra.mxu0 %v962_v46 }
  0x29   :  { %902 = vmatpush3.bf16.msra.mxu1 %v963_v47  ;;  %881 = vmatprep.subr.bf16.mxu0 %v964_v48 }
  0x2a   :  { %903 = vmatprep.subr.bf16.mxu1 %v965_v49 }
  0x2c   :  { %882 = vmatpush3.bf16.msra.mxu0 %v966_v50 }
  0x2d   :  { %904 = vmatpush3.bf16.msra.mxu1 %v967_v51  ;;  %883 = vmatprep.subr.bf16.mxu0 %v968_v52 }
  0x2e   :  { %905 = vmatprep.subr.bf16.mxu1 %v969_v53 }
  0x30   :  { %884 = vmatpush3.bf16.msra.mxu0 %v970_v54 }
  0x31   :  { %906 = vmatpush3.bf16.msra.mxu1 %v971_v55  ;;  %885 = vmatprep.subr.bf16.mxu0 %v972_v56 }
  0x32   :  { %907 = vmatprep.subr.bf16.mxu1 %v973_v57 }
  0x34   :  { %886 = vmatpush3.bf16.msra.mxu0 %v974_v58 }
  0x35   :  { %908 = vmatpush3.bf16.msra.mxu1 %v975_v59  ;;  %887 = vmatprep.subr.bf16.mxu0 %v976_v60 }
  0x36   :  { %909 = vmatprep.subr.bf16.mxu1 %v977_v61 }
  0x38   :  { %888 = vmatpush3.bf16.msra.mxu0 %v978_v62 }
  0x39   :  { %910 = vmatpush3.bf16.msra.mxu1 %v979_v63  ;;  %889 = vmatprep.subr.bf16.mxu0 %v980_v0 }
  0x3a   :  { %911 = vmatprep.subr.bf16.mxu1 %v981_v1 }
  0x3c   :  { %890 = vmatpush3.bf16.msra.mxu0 %v982_v2 }
  0x3d   :  { %912 = vmatpush3.bf16.msra.mxu1 %v983_v3  ;;  %891 = vmatprep.subr.bf16.mxu0 %v984_v4 }
  0x3e   :  { %913 = vmatprep.subr.bf16.mxu1 %v985_v5 }
  0x40   :  { %892 = vmatpush3.bf16.msra.mxu0 %v986_v6 }
  0x41   :  { %8 = vsyncpa [#allocation3], 0  ;;  %914 = vmatpush3.bf16.msra.mxu1 %v987_v7  ;;  %v767_v14 = vcombine.low %v19_v12, %v23_v13  ;;  %v768_v15 = vcombine.high %v19_v12, %v23_v13  ;;  %692 = vmatprep.mubr.bf16.mxu0 %v766_v11  ;;  %v152_v18 = vld [vmem:[%s1271_s2] sm:$0xff]  ;;  %v153_v25 = vld [vmem:[%s1271_s2 + $0x8] sm:$0xff]  ;;  %vm742_vm0 = vcmask 261120   ;;  %s1012_s2 = smov [#allocation2]  }
  0x42   :  { %s750_s23 = sshll.u32 %s1012_s2, 4  ;;  %s751_s23 = int_to_ptr.vmem [resolvable:$true] %s750_s23 }
  0x43   :  { %733 = vmatprep.mubr.bf16.mxu1 %v768_v15  ;;  %693 = vmatmul.mubr.bf16.vlgmr.msra.gmra.mrb[4].mxu0 %v765_v10  ;;  %s988_s24 = scalar_lea.vmem %s751_s23, 256  ;;  %p993_p1 = scmp.lt.s32.totalorder %s751_s23, %s751_s23 }
  0x44   :  { %734 = vmatmul.mubr.bf16.vlgmr.msra.gmra.mrb[4].mxu1 %v767_v14  ;;  %p989_p0 = scmp.ne.s32.totalorder %s751_s23, %s988_s24  ;;  %p994_p2 = scmp.lt.s32.totalorder %s988_s24, %s988_s24 }
  0x46   :  { %p995_p3 = por %p994_p2, %p993_p1 }
  0x48   :  { %p996_p4 = pnand %p995_p3, %p989_p0 }
  0xf6   :  { %v849_v16 = vpop.f32.mrb[0].mxu0 }
  0xf7   :  { %v871_v17 = vpop.f32.mrb[0].mxu1  ;;  %v850_v19 = vpop.f32.mrb[1].mxu0 }
  0xf8   :  { %v851_v20 = vadd.f32 %v850_v19, %v849_v16  ;;  %v872_v21 = vpop.f32.mrb[1].mxu1  ;;  %v852_v22 = vpop.f32.mrb[2].mxu0 }
  0xf9   :  { %v873_v23 = vadd.f32 %v872_v21, %v871_v17  ;;  %v874_v24 = vpop.f32.mrb[2].mxu1  ;;  %v853_v26 = vpop.f32.mrb[3].mxu0 }
  0xfa   :  { %v613_v27 = vadd.f32 %v851_v20, %v152_v18  ;;  %v854_v28 = vadd.f32 %v853_v26, %v852_v22  ;;  %v875_v29 = vpop.f32.mrb[3].mxu1 }
  0xfb   :  { %v876_v30 = vadd.f32 %v875_v29, %v874_v24 }
  0xfc   :  { %v654_v31 = vadd.f32 %v873_v23, %v613_v27  ;;  %v616_v32 = vadd.f32 %v854_v28, %v153_v25 }
  0xfe   :  { %v657_v33 = vadd.f32 %v876_v30, %v616_v32 }
 0x116   :  { %v893_v34 = vpop.f32.mrb[4].mxu0 }
 0x117   :  { %v915_v35 = vpop.f32.mrb[4].mxu1  ;;  %v894_v36 = vpop.f32.mrb[5].mxu0 }
 0x118   :  { %v895_v37 = vadd.f32 %v894_v36, %v893_v34  ;;  %v916_v38 = vpop.f32.mrb[5].mxu1  ;;  %v896_v39 = vpop.f32.mrb[6].mxu0 }
 0x119   :  { %v917_v40 = vadd.f32 %v916_v38, %v915_v35  ;;  %v918_v41 = vpop.f32.mrb[6].mxu1  ;;  %v897_v42 = vpop.f32.mrb[7].mxu0 }
 0x11a   :  { %v695_v43 = vadd.f32 %v895_v37, %v654_v31  ;;  %v898_v44 = vadd.f32 %v897_v42, %v896_v39  ;;  %v919_v45 = vpop.f32.mrb[7].mxu1 }
 0x11b   :  { %v920_v46 = vadd.f32 %v919_v45, %v918_v41 }
 0x11c   :  { %v736_v47 = vadd.f32 %v917_v40, %v695_v43  ;;  %v698_v48 = vadd.f32 %v898_v44, %v657_v33 }
 0x11e   :  { %743 = vst.msk [vmem:[#allocation2] sm:$0xff] %vm742_vm0, %v736_v47  ;;  %v739_v49 = vadd.f32 %v920_v46, %v698_v48 }
 0x120   :  { %744 = vst.msk [vmem:[#allocation2 + $0x8] sm:$0xff] %vm742_vm0, %v739_v49 }
 0x121   :  { %999 = shalt.err (!%p996_p4)
}
 0x122   :  { %s1000_s27 = scalar_lea.hbm %s1272_s3, 256 }
 0x123   :  { %p1001_p5 = scmp.ne.s32.totalorder %s1272_s3, %s1000_s27  ;;  %p1004_p6 = scmp.lt.u32.totalorder %s1000_s27, %s1272_s3 }
 0x125   :  { %p1006_p7 = pnand %p1004_p6, %p1001_p5 }
 0x127   :  { %1009 = shalt.err (!%p1006_p7)
}
 0x128   :  { %s1013_s5 = smov 128   ;;  %s1014_s6 = smov 8  }
 0x129   :  { %756 = dma.vmem_to_hbm [thread:$0]  %s751_s23, 256, %s1272_s3, [#allocation3], %s1013_s5, %s1013_s5, %s1014_s6  }
 0x12a   :  { %1010 = dma.done.wait [#allocation3], 256  }
 0x12b   :  { %1011 = vsyncadd [#allocation3], 4294967040 }
 0x12c   :  { %760 = vsyncpa [#allocation3], 1 }

</bundles_post_ra>
